<compile_context>
chip_gen: v5e
topology: v5e:2x2
jax: 0.10.0
libtpu: 0.0.40
codegen_flags: <defaults>
</compile_context>

<pallas_src>
import jax
import jax.numpy as jnp
from jax.experimental import pallas as pl
from jax.experimental.pallas import tpu as pltpu


def _flexible_adder_kernel(x_ref, add_ref, o_ref):
    # x block: (Bt, C); add block: (1, C) -> broadcasts along the batch axis.
    o_ref[...] = (x_ref[...] + add_ref[...]).astype(o_ref.dtype)


def _choose_batch_tile(B: int, C: int, itemsize: int,
                       max_block_bytes: int = 4 << 20,
                       min_grid_steps: int = 8) -> int:
    """Rows per block: as large as possible (amortize per-step overhead) while
    (a) block <= max_block_bytes so 2x(x) + 2x(out) buffers stay well inside
        VMEM on every generation (v7x: 64 MiB physical),
    (b) a multiple of 8 (sublane rule) unless it covers the whole batch,
    (c) enough grid steps remain for v7x's two TensorCores when B is large.
    """
    bytes_per_row = C * itemsize
    rows_budget = max(int(max_block_bytes // bytes_per_row), 1)
    if rows_budget >= B:
        bt = B  # one block covers the whole batch (full-dim satisfies tiling rule)
    else:
        bt = max((rows_budget // 8) * 8, 8)
    if B >= min_grid_steps * 8:
        # Keep at least `min_grid_steps` grid steps so both TCs get work.
        max_bt_for_steps = max(((B // min_grid_steps) // 8) * 8, 8)
        bt = min(bt, max_bt_for_steps)
    return min(bt, B)


def flexible_adder(x: jax.Array, amount_to_add: jax.Array,
                   *, max_block_bytes: int = 4 << 20) -> jax.Array:
    """out = x + amount_to_add; amount_to_add (M, N) broadcasts over all
    leading dims of x, matching PyTorch right-aligned broadcasting."""
    M, N = amount_to_add.shape
    assert x.shape[-2:] == (M, N), "trailing dims of x must equal adder_dims"

    lead = x.shape[:-2]
    B = 1
    for d in lead:
        B *= int(d)
    C = M * N  # flattened, lane-dense last axis (512 in the example)

    out_dtype = jnp.result_type(x.dtype, amount_to_add.dtype)
    itemsize = jnp.dtype(out_dtype).itemsize

    x2d = x.reshape(B, C)
    add2d = amount_to_add.reshape(1, C)

    bt = _choose_batch_tile(B, C, itemsize, max_block_bytes)
    grid = (pl.cdiv(B, bt),)

    # VMEM budget: x + out double-buffered, resident param (double-buffered
    # worst case), plus ~1 MiB headroom for compiler scratch. Clamp to a range
    # that is safe on v5e (128 MiB), v6e (128 MiB) and v7x (64 MiB).
    block_bytes = bt * C * itemsize
    param_bytes = C * jnp.dtype(amount_to_add.dtype).itemsize
    vmem_bytes = 4 * block_bytes + 2 * param_bytes + (1 << 20)
    vmem_bytes = int(min(max(vmem_bytes, 16 << 20), 48 << 20))

    out2d = pl.pallas_call(
        _flexible_adder_kernel,
        out_shape=jax.ShapeDtypeStruct((B, C), out_dtype),
        grid_spec=pltpu.PrefetchScalarGridSpec(
            num_scalar_prefetch=0,
            grid=grid,
            in_specs=[
                # Bt batch rows per step; full lane-dense last dim.
                pl.BlockSpec((bt, C), lambda b: (b, 0)),
                # Parameter block is the same every step (resident, no re-DMA).
                pl.BlockSpec((1, C), lambda b: (0, 0)),
            ],
            out_specs=pl.BlockSpec((bt, C), lambda b: (b, 0)),
        ),
        compiler_params=pltpu.CompilerParams(
            dimension_semantics=("parallel",),
            vmem_limit_bytes=vmem_bytes,
        ),
    )(x2d, add2d)

    return out2d.reshape(x.shape)


if __name__ == "__main__":
    key = jax.random.PRNGKey(0)
    k_x, k_param = jax.random.split(key)

    # Small shapes consistent with the module: adder_dims = (16, 32),
    # x batched as (2, 16, 32). M*N = 512 -> lane-dense flattened axis.
    adder_dims = (16, 32)
    x = jax.random.normal(k_x, (2, *adder_dims), dtype=jnp.float32)

    # Parameter init mirroring reset_parameters(): Uniform[0, 1) of adder_dims.
    amount_to_add = jax.random.uniform(k_param, adder_dims, dtype=jnp.float32)

    out = flexible_adder(x, amount_to_add)
    out = jax.block_until_ready(out)

    # Correctness check against plain-JAX broadcasted add.
    ref = x + amount_to_add[None, :, :]
    assert out.shape == x.shape
    assert jnp.allclose(out, ref, atol=1e-6), "mismatch vs reference add"

    print("KERNEL_OK")
</pallas_src>

<mosaic_0001>
module attributes {stable_mosaic.version = 11 : i64} {
  func.func @_flexible_adder_kernel(%arg0: i32, %arg1: memref<2x512xf32, #tpu.memory_space<vmem>>, %arg2: memref<1x512xf32, #tpu.memory_space<vmem>>, %arg3: memref<2x512xf32, #tpu.memory_space<vmem>>) attributes {dimension_semantics = [#tpu.dimension_semantics<parallel>], iteration_bounds = array<i64: 1>, scalar_prefetch = 0 : i64, scratch_operands = 0 : i64, tpu.core_type = #tpu.core_type<tc>, window_params = [{transform_indices = @transform_0, window_bounds = array<i64: 2, 512>}, {pipeline_mode = #tpu.pipeline_mode<synchronous>, transform_indices = @transform_1, window_bounds = array<i64: 1, 512>}, {transform_indices = @transform_2, window_bounds = array<i64: 2, 512>}]} {
    %c0 = arith.constant 0 : index
    %c0_0 = arith.constant 0 : index
    %0 = vector.load %arg1[%c0, %c0_0] : memref<2x512xf32, #tpu.memory_space<vmem>>, vector<2x512xf32>
    %c0_1 = arith.constant 0 : index
    %c0_2 = arith.constant 0 : index
    %1 = vector.load %arg2[%c0_1, %c0_2] : memref<1x512xf32, #tpu.memory_space<vmem>>, vector<1x512xf32>
    %2 = vector.broadcast %1 : vector<1x512xf32> to vector<2x512xf32>
    %3 = arith.addf %0, %2 : vector<2x512xf32>
    %c0_3 = arith.constant 0 : index
    %c0_4 = arith.constant 0 : index
    %4 = vector.load %arg3[%c0_3, %c0_4] : memref<2x512xf32, #tpu.memory_space<vmem>>, vector<2x512xf32>
    tpu.vector_store %arg3[%c0_3, %c0_4], %3 {strides = array<i32>} : memref<2x512xf32, #tpu.memory_space<vmem>>, vector<2x512xf32>,
    return
  }
  func.func @transform_0(%arg0: i32) -> (i32, i32) {
    %c0_i32 = arith.constant 0 : i32
    %c0_i32_0 = arith.constant 0 : i32
    return %arg0, %c0_i32 : i32, i32
  }
  func.func @transform_1(%arg0: i32) -> (i32, i32) {
    %c0_i32 = arith.constant 0 : i32
    %c0_i32_0 = arith.constant 0 : i32
    %c0_i32_1 = arith.constant 0 : i32
    return %c0_i32, %c0_i32_0 : i32, i32
  }
  func.func @transform_2(%arg0: i32) -> (i32, i32) {
    %c0_i32 = arith.constant 0 : i32
    %c0_i32_0 = arith.constant 0 : i32
    return %arg0, %c0_i32 : i32, i32
  }
}

</mosaic_0001>

<bundles_post_ra>
// kernel: tpu_custom_call.1
= control target key start
LH: loop header
LB: loop body
LE: loop exit
PB: predicated region body
PF: predicated region fallthrough
CT: control target
= control target key end

     0   :  { %7 = vsyncpa [#allocation3], 0  ;;  %s185_s0 = inlined_call_operand.hbm [shape: f32[2,512], index: 0, kind: input, shape index: {}]   ;;  %s186_s1 = inlined_call_operand.hbm [shape: f32[1,512], index: 1, kind: input, shape index: {}]   ;;  %s187_s2 = inlined_call_operand.hbm [shape: f32[2,512], index: 2, kind: output, shape index: {}]  }
   0x1   :  { %8 = vsyncpa [#allocation6], 0 }
   0x2   :  { %9 = vsyncpa [#allocation4], 0  ;;  %s15_s11 = sshll.u32 %s185_s0, 4  ;;  %s158_s12 = smov [#allocation2]   ;;  %s16_s11 = int_to_ptr.hbm [resolvable:$true] %s15_s11 }
   0x3   :  { %s17_s13 = sshll.u32 %s158_s12, 4  ;;  %s26_s16 = sshll.u32 %s186_s1, 4  ;;  %s18_s13 = int_to_ptr.vmem [resolvable:$true] %s17_s13  ;;  %s27_s16 = int_to_ptr.hbm [resolvable:$true] %s26_s16 }
   0x4   :  { %20 = dma.hbm_to_vmem [thread:$0]  %s16_s11, 128, %s18_s13, [#allocation3]  }
   0x5   :  { %s159_s17 = smov [#allocation5]  }
   0x6   :  { %s28_s18 = sshll.u32 %s159_s17, 4  ;;  %s29_s18 = int_to_ptr.vmem [resolvable:$true] %s28_s18 }
   0x7   :  { %31 = dma.hbm_to_vmem [thread:$0]  %s27_s16, 64, %s29_s18, [#allocation6]  }
   0x8   :  { %152 = dma.done.wait [#allocation3], 128  }
   0x9   :  { %153 = vsyncadd [#allocation3], 4294967168 }
   0xa   :  { %154 = dma.done.wait [#allocation6], 64  }
   0xb   :  { %155 = vsyncadd [#allocation6], 4294967232  ;;  %v41_v0 = vld [vmem:[#allocation5] sm:$0xf]  ;;  %vm50_vm0 = vcmask 1041408   ;;  %vm52_vm1 = vcmask 1045508  }
   0xc   :  { %v43_v1 = vperm.slane %v41_v0, 0  ;;  %v44_v2 = vperm.slane %v41_v0, 1  ;;  %v45_v3 = vperm.slane %v41_v0, 2  ;;  %v46_v4 = vperm.slane %v41_v0, 3  ;;  %v40_v8 = vld [vmem:[#allocation2] sm:$0xff]  ;;  %s160_s0 = smov [#allocation7]  }
   0xd   :  { %vm54_vm2 = vcmask 1043456   ;;  %s64_s1 = sshll.u32 %s160_s0, 4  ;;  %s66_s21 = sshll.u32 %s187_s2, 4  ;;  %s65_s1 = int_to_ptr.vmem [resolvable:$true] %s64_s1  ;;  %s67_s21 = int_to_ptr.hbm [resolvable:$true] %s66_s21 }
   0xe   :  { %v47_v5 = vrot.slane %v44_v2, 6  ;;  %v48_v6 = vrot.slane %v45_v3, 4  ;;  %v49_v7 = vrot.slane %v46_v4, 2 }
  0x10   :  { %v51_v9 = vsel %vm50_vm0, %v43_v1, %v47_v5  ;;  %v53_v10 = vsel %vm52_vm1, %v48_v6, %v49_v7 }
  0x11   :  { %v55_v11 = vsel %vm54_vm2, %v51_v9, %v53_v10 }
  0x12   :  { %v57_v12 = vadd.f32 %v55_v11, %v40_v8 }
  0x14   :  { %58 = vst [vmem:[#allocation7] sm:$0xff] %v57_v12 }
  0x15   :  { %69 = dma.vmem_to_hbm [thread:$0]  %s65_s1, 128, %s67_s21, [#allocation4]  }
  0x16   :  { %156 = dma.done.wait [#allocation4], 128  }
  0x17   :  { %157 = vsyncadd [#allocation4], 4294967168 }
  0x18   :  { %74 = vsyncpa [#allocation3], 1 }
  0x19   :  { %75 = vsyncpa [#allocation6], 1 }
  0x1a   :  { %76 = vsyncpa [#allocation4], 1 }

</bundles_post_ra>
